<compile_context>
chip_gen: v7x
topology: tpu7x:2x2x1
jax: 0.10.0
libtpu: 0.0.40
codegen_flags: <defaults>
</compile_context>

<pallas_src>
import math

import jax
import jax.numpy as jnp
from jax.experimental import pallas as pl
from jax.experimental.pallas import tpu as pltpu


def _round_up(x, m):
    return ((x + m - 1) // m) * m


def _choose_pack(d_inp, d_model, itemsize=4, max_weight_bytes=2 << 20):
    """Rows fused per kernel row so packed rows are lane-dense (x128)."""
    base = 128 // math.gcd(d_model, 128)          # makes pack*d_model % 128 == 0
    k_align = 128 // math.gcd(d_inp, 128)         # makes pack*d_inp  % 128 == 0
    full = base * k_align // math.gcd(base, k_align)   # lcm(base, k_align)
    for p in (full, base, 1):
        if (p * d_inp) * (p * d_model) * itemsize <= max_weight_bytes:
            return p
    return 1


def pack_linear_params(weight, bias, pack):
    """Build block-diagonal kron(I_pack, W^T) and tiled bias (hoist per-call)."""
    d_model = weight.shape[0]
    wg = jnp.kron(jnp.eye(pack, dtype=weight.dtype), weight.T)  # (pack*K, pack*N)
    bg = jnp.tile(bias, pack).reshape(1, pack * d_model)
    return wg, bg


def _time_feature_embed_kernel(x_ref, w_ref, b_ref, o_ref):
    # x_ref: (TG, pack*d_inp)            grouped time features
    # w_ref: (pack*d_inp, pack*d_model)  block-diagonal kron(I_pack, W^T)
    # b_ref: (1, pack*d_model)           tiled bias
    # o_ref: (TG, pack*d_model)          lane-dense output
    acc = jnp.dot(x_ref[...], w_ref[...], preferred_element_type=jnp.float32)
    o_ref[...] = (acc + b_ref[...]).astype(o_ref.dtype)


def time_feature_embedding(x, weight, bias, *, tile_rows=32768, packed_params=None):
    """x: (B, L, d_inp) float32; weight: (d_model, d_inp); bias: (d_model,)."""
    B, L, d_inp = x.shape
    d_model = weight.shape[0]
    M = B * L

    pack = _choose_pack(d_inp, d_model)
    kg = pack * d_inp
    ng = pack * d_model

    if packed_params is None:
        wg, bg = pack_linear_params(weight, bias, pack)
    else:
        wg, bg = packed_params

    # Pad only to `pack` granularity (<= pack-1 rows); ragged tiles are
    # handled by the grid itself.
    m_pad = _round_up(M, pack)
    x2d = x.reshape(M, d_inp)
    if m_pad != M:
        x2d = jnp.pad(x2d, ((0, m_pad - M), (0, 0)))
    M_g = m_pad // pack
    xg = x2d.reshape(M_g, kg)

    # Tile over packed rows.  >= 2 grid steps whenever possible (v7x dual-TC);
    # tiny inputs collapse to a single full-extent block.
    if M_g <= 8:
        tg = M_g
    else:
        tg_cap = max(tile_rows // pack, 8)
        tg = min(_round_up(tg_cap, 8), _round_up(pl.cdiv(M_g, 2), 8))
    grid = pl.cdiv(M_g, tg)

    cost = pl.CostEstimate(
        flops=2 * M * d_inp * d_model,
        bytes_accessed=4 * (M * d_inp + M * d_model) + 4 * (wg.size + bg.size),
        transcendentals=0,
    )

    out_g = pl.pallas_call(
        _time_feature_embed_kernel,
        out_shape=jax.ShapeDtypeStruct((M_g, ng), x.dtype),
        grid_spec=pltpu.PrefetchScalarGridSpec(
            num_scalar_prefetch=0,
            grid=(grid,),
            in_specs=[
                pl.BlockSpec((tg, kg), lambda i: (i, 0)),   # streamed input tiles
                pl.BlockSpec((kg, ng), lambda i: (0, 0)),   # weight, resident
                pl.BlockSpec((1, ng), lambda i: (0, 0)),    # bias, resident
            ],
            out_specs=pl.BlockSpec((tg, ng), lambda i: (i, 0)),
        ),
        compiler_params=pltpu.CompilerParams(
            dimension_semantics=("parallel",)),
        cost_estimate=cost,
    )(xg, wg, bg)

    out2d = out_g.reshape(m_pad, d_model)
    if m_pad != M:
        out2d = out2d[:M]
    return out2d.reshape(B, L, d_model)


if __name__ == "__main__":
    # freq='h' -> d_inp = 4; small shapes for the demo.
    d_inp = 4
    d_model = 32
    B, L = 2, 8

    key = jax.random.PRNGKey(0)
    kx, kw, kb = jax.random.split(key, 3)

    # Deterministic synthetic parameters (shapes match nn.Linear(d_inp, d_model)).
    bound = 1.0 / (d_inp ** 0.5)
    weight = jax.random.uniform(kw, (d_model, d_inp), jnp.float32, -bound, bound)
    bias = jax.random.uniform(kb, (d_model,), jnp.float32, -bound, bound)

    x = jax.random.normal(kx, (B, L, d_inp), jnp.float32)

    out = time_feature_embedding(x, weight, bias)
    out = jax.block_until_ready(out)

    # Reference check in plain JAX.
    ref = x @ weight.T + bias
    assert out.shape == (B, L, d_model)
    assert jnp.allclose(out, ref, atol=1e-4, rtol=1e-4)

    print("KERNEL_OK")
</pallas_src>

<mosaic_0001>
module attributes {stable_mosaic.version = 11 : i64} {
  func.func @_time_feature_embed_kernel(%arg0: i32, %arg1: memref<1x128xf32, #tpu.memory_space<vmem>>, %arg2: memref<128x1024xf32, #tpu.memory_space<vmem>>, %arg3: memref<1x1024xf32, #tpu.memory_space<vmem>>, %arg4: memref<1x1024xf32, #tpu.memory_space<vmem>>) attributes {dimension_semantics = [#tpu.dimension_semantics<parallel>], iteration_bounds = array<i64: 1>, scalar_prefetch = 0 : i64, scratch_operands = 0 : i64, tpu.core_type = #tpu.core_type<tc>, window_params = [{transform_indices = @transform_0, window_bounds = array<i64: 1, 128>}, {pipeline_mode = #tpu.pipeline_mode<synchronous>, transform_indices = @transform_1, window_bounds = array<i64: 128, 1024>}, {pipeline_mode = #tpu.pipeline_mode<synchronous>, transform_indices = @transform_2, window_bounds = array<i64: 1, 1024>}, {transform_indices = @transform_3, window_bounds = array<i64: 1, 1024>}]} {
    %c0 = arith.constant 0 : index
    %c0_0 = arith.constant 0 : index
    %0 = vector.load %arg1[%c0, %c0_0] : memref<1x128xf32, #tpu.memory_space<vmem>>, vector<1x128xf32>
    %c0_1 = arith.constant 0 : index
    %c0_2 = arith.constant 0 : index
    %1 = vector.load %arg2[%c0_1, %c0_2] : memref<128x1024xf32, #tpu.memory_space<vmem>>, vector<128x1024xf32>
    %cst = arith.constant dense<0.000000e+00> : vector<1x1024xf32>
    %2 = tpu.matmul %0, %1, %cst {dimension_numbers = #tpu.dot_dimension_numbers<[1], [0], [0], [1], [0, 0, 1, 1], [], []>} : vector<1x128xf32>, vector<128x1024xf32>, vector<1x1024xf32> -> vector<1x1024xf32>
    %c0_3 = arith.constant 0 : index
    %c0_4 = arith.constant 0 : index
    %3 = vector.load %arg3[%c0_3, %c0_4] : memref<1x1024xf32, #tpu.memory_space<vmem>>, vector<1x1024xf32>
    %4 = arith.addf %2, %3 : vector<1x1024xf32>
    %c0_5 = arith.constant 0 : index
    %c0_6 = arith.constant 0 : index
    %5 = vector.load %arg4[%c0_5, %c0_6] : memref<1x1024xf32, #tpu.memory_space<vmem>>, vector<1x1024xf32>
    tpu.vector_store %arg4[%c0_5, %c0_6], %4 {strides = array<i32>} : memref<1x1024xf32, #tpu.memory_space<vmem>>, vector<1x1024xf32>,
    return
  }
  func.func @transform_0(%arg0: i32) -> (i32, i32) {
    %c0_i32 = arith.constant 0 : i32
    %c0_i32_0 = arith.constant 0 : i32
    return %arg0, %c0_i32 : i32, i32
  }
  func.func @transform_1(%arg0: i32) -> (i32, i32) {
    %c0_i32 = arith.constant 0 : i32
    %c0_i32_0 = arith.constant 0 : i32
    %c0_i32_1 = arith.constant 0 : i32
    return %c0_i32, %c0_i32_0 : i32, i32
  }
  func.func @transform_2(%arg0: i32) -> (i32, i32) {
    %c0_i32 = arith.constant 0 : i32
    %c0_i32_0 = arith.constant 0 : i32
    %c0_i32_1 = arith.constant 0 : i32
    return %c0_i32, %c0_i32_0 : i32, i32
  }
  func.func @transform_3(%arg0: i32) -> (i32, i32) {
    %c0_i32 = arith.constant 0 : i32
    %c0_i32_0 = arith.constant 0 : i32
    return %arg0, %c0_i32 : i32, i32
  }
}

</mosaic_0001>

<bundles_post_ra>
// kernel: tpu_custom_call.1
= control target key start
LH: loop header
LB: loop body
LE: loop exit
PB: predicated region body
PF: predicated region fallthrough
CT: control target
= control target key end

     0   :  { %8 = vsyncpa [#allocation3], 0  ;;  %s898_s0 = inlined_call_operand.hbm [shape: f32[1,128], index: 0, kind: input, shape index: {}]   ;;  %s899_s1 = inlined_call_operand.hbm [shape: f32[128,1024], index: 1, kind: input, shape index: {}]   ;;  %s900_s2 = inlined_call_operand.hbm [shape: f32[1,1024], index: 2, kind: input, shape index: {}]   ;;  %s901_s3 = inlined_call_operand.hbm [shape: f32[1,1024], index: 3, kind: output, shape index: {}]  }
   0x1   :  { %9 = vsyncpa [#allocation6], 0 }
   0x2   :  { %10 = vsyncpa [#allocation4], 0  ;;  %s812_s12 = smov [#allocation5]   ;;  %s718_s16 = scalar_lea.hbm %s899_s1, 16384 }
   0x3   :  { %s26_s13 = sshll.u32 %s812_s12, 4  ;;  %p719_p0 = scmp.ne.s32.totalorder %s899_s1, %s718_s16  ;;  %s27_s13 = int_to_ptr.vmem [resolvable:$true] %s26_s13 }
   0x4   :  { %p722_p1 = scmp.lt.u32.totalorder %s718_s16, %s899_s1 }
   0x6   :  { %p724_p2 = pnand %p722_p1, %p719_p0 }
   0x8   :  { %727 = shalt.err (!%p724_p2)
}
   0x9   :  { %s728_s21 = scalar_lea.vmem %s27_s13, 16384  ;;  %p733_p4 = scmp.lt.s32.totalorder %s27_s13, %s27_s13 }
   0xa   :  { %p729_p3 = scmp.ne.s32.totalorder %s27_s13, %s728_s21  ;;  %p734_p5 = scmp.lt.s32.totalorder %s728_s21, %s728_s21 }
   0xc   :  { %p735_p6 = por %p734_p5, %p733_p4 }
   0xe   :  { %p736_p7 = pnand %p735_p6, %p729_p3 }
  0x10   :  { %739 = shalt.err (!%p736_p7)
}
  0x11   :  { %s813_s22 = smov 1024   ;;  %s814_s23 = smov 64  }
  0x12   :  { %32 = dma.hbm_to_vmem [thread:$0]  %s899_s1, 16384, %s27_s13, [#allocation6], %s813_s22, %s813_s22, %s814_s23  }
  0x13   :  { %s815_s26 = smov [#allocation2]   ;;  %s816_s28 = smov [#allocation7]  }
  0x14   :  { %s17_s27 = sshll.u32 %s815_s26, 4  ;;  %s39_s29 = sshll.u32 %s816_s28, 4  ;;  %s18_s27 = int_to_ptr.vmem [resolvable:$true] %s17_s27  ;;  %s40_s29 = int_to_ptr.vmem [resolvable:$true] %s39_s29 }
  0x15   :  { %s740_s5 = scalar_lea.hbm %s898_s0, 16 }
  0x16   :  { %p741_p8 = scmp.ne.s32.totalorder %s898_s0, %s740_s5  ;;  %p744_p9 = scmp.lt.u32.totalorder %s740_s5, %s898_s0 }
  0x18   :  { %p746_p10 = pnand %p744_p9, %p741_p8 }
  0x1a   :  { %749 = shalt.err (!%p746_p10)
}
  0x1b   :  { %s750_s1 = scalar_lea.vmem %s18_s27, 16  ;;  %s754_s10 = scalar_lea.vmem %s18_s27, 32 }
  0x1c   :  { %p751_p11 = scmp.ne.s32.totalorder %s18_s27, %s750_s1  ;;  %p755_p12 = scmp.lt.s32.totalorder %s18_s27, %s18_s27 }
  0x1d   :  { %p756_p13 = scmp.lt.s32.totalorder %s754_s10, %s750_s1 }
  0x1f   :  { %p757_p0 = por %p756_p13, %p755_p12 }
  0x21   :  { %p758_p1 = pnand %p757_p0, %p751_p11 }
  0x23   :  { %761 = shalt.err (!%p758_p1)
}
  0x24   :  { %20 = dma.hbm_to_vmem [thread:$0]  %s898_s0, 16, %s18_s27, [#allocation3]  }
  0x25   :  { %s762_s15 = scalar_lea.hbm %s900_s2, 128 }
  0x26   :  { %p763_p2 = scmp.ne.s32.totalorder %s900_s2, %s762_s15  ;;  %p766_p3 = scmp.lt.u32.totalorder %s762_s15, %s900_s2 }
  0x28   :  { %p768_p4 = pnand %p766_p3, %p763_p2 }
  0x2a   :  { %771 = shalt.err (!%p768_p4)
}
  0x2b   :  { %s772_s20 = scalar_lea.vmem %s40_s29, 128  ;;  %p777_p6 = scmp.lt.s32.totalorder %s40_s29, %s40_s29 }
  0x2c   :  { %p773_p5 = scmp.ne.s32.totalorder %s40_s29, %s772_s20  ;;  %p778_p7 = scmp.lt.s32.totalorder %s772_s20, %s772_s20 }
  0x2e   :  { %p779_p8 = por %p778_p7, %p777_p6 }
  0x30   :  { %p780_p9 = pnand %p779_p8, %p773_p5 }
  0x32   :  { %783 = shalt.err (!%p780_p9)
}
  0x33   :  { %42 = dma.hbm_to_vmem [thread:$0]  %s900_s2, 128, %s40_s29, [#allocation6]  }
  0x34   :  { %806 = dma.done.wait [#allocation3], 16  }
  0x35   :  { %807 = vsyncadd [#allocation3], 4294967280 }
  0x36   :  { %808 = dma.done.wait [#allocation6], 16512  }
  0x37   :  { %809 = vsyncadd [#allocation6], 4294950784  ;;  %v817_v0 = vmov 0.0   ;;  %v54_v1 = vld [vmem:[#allocation5 + $0x8] sm:$0xff]  ;;  %v56_v3 = vld [vmem:[#allocation5 + $0x18] sm:$0xff]  ;;  %s819_s2 = smov [#allocation8]  }
  0x38   :  { %287 = vmatprep.mubr.f32.mxu0 %v817_v0  ;;  %358 = vmatprep.mubr.f32.mxu1 %v817_v0  ;;  %v62_v2 = vld [vmem:[#allocation5 + $0x48] sm:$0xff]  ;;  %v64_v5 = vld [vmem:[#allocation5 + $0x58] sm:$0xff]  ;;  %v53_v6 = vld [vmem:[#allocation5] sm:$0xff]  ;;  %s572_s22 = sshll.u32 %s819_s2, 4  ;;  %s573_s22 = int_to_ptr.vmem [resolvable:$true] %s572_s22 }
  0x39   :  { %v582_v4 = vpack.c.bf16 %v62_v2, %v54_v1  ;;  %v61_v7 = vld [vmem:[#allocation5 + $0x40] sm:$0xff]  ;;  %v614_v8 = vpack.c.bf16 %v64_v5, %v56_v3  ;;  %v55_v10 = vld [vmem:[#allocation5 + $0x10] sm:$0xff]  ;;  %v70_v12 = vld [vmem:[#allocation5 + $0x88] sm:$0xff]  ;;  %s784_s23 = scalar_lea.vmem %s573_s22, 128  ;;  %p789_p11 = scmp.lt.s32.totalorder %s573_s22, %s573_s22 }
  0x3a   :  { %v584_v9 = vpack.c.bf16 %v61_v7, %v53_v6  ;;  %v63_v11 = vld [vmem:[#allocation5 + $0x50] sm:$0xff]  ;;  %v78_v14 = vld [vmem:[#allocation5 + $0xc8] sm:$0xff]  ;;  %v72_v15 = vld [vmem:[#allocation5 + $0x98] sm:$0xff]  ;;  %p785_p10 = scmp.ne.s32.totalorder %s573_s22, %s784_s23  ;;  %p790_p12 = scmp.lt.s32.totalorder %s784_s23, %s784_s23 }
  0x3b   :  { %583 = vmatprep.subr.bf16.mxu0 %v582_v4  ;;  %v616_v13 = vpack.c.bf16 %v63_v11, %v55_v10  ;;  %v80_v16 = vld [vmem:[#allocation5 + $0xd8] sm:$0xff]  ;;  %615 = vmatprep.subr.bf16.mxu1 %v614_v8  ;;  %v586_v17 = vpack.c.bf16 %v78_v14, %v70_v12  ;;  %v69_v19 = vld [vmem:[#allocation5 + $0x80] sm:$0xff]  ;;  %v71_v21 = vld [vmem:[#allocation5 + $0x90] sm:$0xff] }
  0x3c   :  { %585 = vmatpush1.bf16.msra.mxu0 %v584_v9  ;;  %v618_v18 = vpack.c.bf16 %v80_v16, %v72_v15  ;;  %v77_v20 = vld [vmem:[#allocation5 + $0xc0] sm:$0xff]  ;;  %v79_v23 = vld [vmem:[#allocation5 + $0xd0] sm:$0xff]  ;;  %v86_v24 = vld [vmem:[#allocation5 + $0x108] sm:$0xff]  ;;  %p791_p13 = por %p790_p12, %p789_p11 }
  0x3d   :  { %617 = vmatpush1.bf16.msra.mxu1 %v616_v13  ;;  %v588_v22 = vpack.c.bf16 %v77_v20, %v69_v19  ;;  %v94_v25 = vld [vmem:[#allocation5 + $0x148] sm:$0xff]  ;;  %587 = vmatprep.subr.bf16.mxu0 %v586_v17  ;;  %v620_v26 = vpack.c.bf16 %v79_v23, %v71_v21  ;;  %v88_v28 = vld [vmem:[#allocation5 + $0x118] sm:$0xff]  ;;  %v85_v30 = vld [vmem:[#allocation5 + $0x100] sm:$0xff] }
  0x3e   :  { %619 = vmatprep.subr.bf16.mxu1 %v618_v18  ;;  %v590_v27 = vpack.c.bf16 %v94_v25, %v86_v24  ;;  %v96_v29 = vld [vmem:[#allocation5 + $0x158] sm:$0xff]  ;;  %v93_v32 = vld [vmem:[#allocation5 + $0x140] sm:$0xff]  ;;  %v87_v33 = vld [vmem:[#allocation5 + $0x110] sm:$0xff]  ;;  %p792_p0 = pnand %p791_p13, %p785_p10 }
  0x3f   :  { %v622_v31 = vpack.c.bf16 %v96_v29, %v88_v28  ;;  %v95_v34 = vld [vmem:[#allocation5 + $0x150] sm:$0xff]  ;;  %v592_v35 = vpack.c.bf16 %v93_v32, %v85_v30  ;;  %v102_v36 = vld [vmem:[#allocation5 + $0x188] sm:$0xff]  ;;  %v104_v38 = vld [vmem:[#allocation5 + $0x198] sm:$0xff] }
  0x40   :  { %589 = vmatpush1.bf16.msra.mxu0 %v588_v22  ;;  %v110_v37 = vld [vmem:[#allocation5 + $0x1c8] sm:$0xff]  ;;  %v624_v39 = vpack.c.bf16 %v95_v34, %v87_v33  ;;  %v112_v41 = vld [vmem:[#allocation5 + $0x1d8] sm:$0xff]  ;;  %v101_v42 = vld [vmem:[#allocation5 + $0x180] sm:$0xff] }
  0x41   :  { %621 = vmatpush1.bf16.msra.mxu1 %v620_v26  ;;  %591 = vmatprep.subr.bf16.mxu0 %v590_v27  ;;  %v594_v40 = vpack.c.bf16 %v110_v37, %v102_v36  ;;  %v109_v43 = vld [vmem:[#allocation5 + $0x1c0] sm:$0xff]  ;;  %v626_v44 = vpack.c.bf16 %v112_v41, %v104_v38  ;;  %v103_v45 = vld [vmem:[#allocation5 + $0x190] sm:$0xff]  ;;  %v118_v47 = vld [vmem:[#allocation5 + $0x208] sm:$0xff] }
  0x42   :  { %623 = vmatprep.subr.bf16.mxu1 %v622_v31  ;;  %v111_v46 = vld [vmem:[#allocation5 + $0x1d0] sm:$0xff]  ;;  %v126_v48 = vld [vmem:[#allocation5 + $0x248] sm:$0xff]  ;;  %v120_v49 = vld [vmem:[#allocation5 + $0x218] sm:$0xff]  ;;  %v596_v51 = vpack.c.bf16 %v109_v43, %v101_v42 }
  0x43   :  { %v128_v50 = vld [vmem:[#allocation5 + $0x258] sm:$0xff]  ;;  %v628_v52 = vpack.c.bf16 %v111_v46, %v103_v45  ;;  %v598_v53 = vpack.c.bf16 %v126_v48, %v118_v47  ;;  %v117_v54 = vld [vmem:[#allocation5 + $0x200] sm:$0xff]  ;;  %v119_v56 = vld [vmem:[#allocation5 + $0x210] sm:$0xff] }
  0x44   :  { %593 = vmatpush1.bf16.msra.mxu0 %v592_v35  ;;  %v125_v55 = vld [vmem:[#allocation5 + $0x240] sm:$0xff]  ;;  %v630_v57 = vpack.c.bf16 %v128_v50, %v120_v49  ;;  %v127_v58 = vld [vmem:[#allocation5 + $0x250] sm:$0xff]  ;;  %v134_v59 = vld [vmem:[#allocation5 + $0x288] sm:$0xff] }
  0x45   :  { %625 = vmatpush1.bf16.msra.mxu1 %v624_v39  ;;  %595 = vmatprep.subr.bf16.mxu0 %v594_v40  ;;  %v142_v60 = vld [vmem:[#allocation5 + $0x2c8] sm:$0xff]  ;;  %v136_v61 = vld [vmem:[#allocation5 + $0x298] sm:$0xff]  ;;  %v600_v63 = vpack.c.bf16 %v125_v55, %v117_v54  ;;  %v632_v1 = vpack.c.bf16 %v127_v58, %v119_v56  ;;  %v133_v3 = vld [vmem:[#allocation5 + $0x280] sm:$0xff] }
  0x46   :  { %627 = vmatprep.subr.bf16.mxu1 %v626_v44  ;;  %v144_v62 = vld [vmem:[#allocation5 + $0x2d8] sm:$0xff]  ;;  %v602_v2 = vpack.c.bf16 %v142_v60, %v134_v59  ;;  %v141_v4 = vld [vmem:[#allocation5 + $0x2c0] sm:$0xff]  ;;  %v135_v5 = vld [vmem:[#allocation5 + $0x290] sm:$0xff] }
  0x47   :  { %v634_v6 = vpack.c.bf16 %v144_v62, %v136_v61  ;;  %v143_v7 = vld [vmem:[#allocation5 + $0x2d0] sm:$0xff]  ;;  %v150_v8 = vld [vmem:[#allocation5 + $0x308] sm:$0xff]  ;;  %v152_v10 = vld [vmem:[#allocation5 + $0x318] sm:$0xff]  ;;  %v604_v12 = vpack.c.bf16 %v141_v4, %v133_v3 }
  0x48   :  { %597 = vmatpush1.bf16.msra.mxu0 %v596_v51  ;;  %v158_v9 = vld [vmem:[#allocation5 + $0x348] sm:$0xff]  ;;  %v160_v11 = vld [vmem:[#allocation5 + $0x358] sm:$0xff]  ;;  %v636_v13 = vpack.c.bf16 %v143_v7, %v135_v5  ;;  %v149_v15 = vld [vmem:[#allocation5 + $0x300] sm:$0xff] }
  0x49   :  { %629 = vmatpush1.bf16.msra.mxu1 %v628_v52  ;;  %599 = vmatprep.subr.bf16.mxu0 %v598_v53  ;;  %v606_v14 = vpack.c.bf16 %v158_v9, %v150_v8  ;;  %v157_v16 = vld [vmem:[#allocation5 + $0x340] sm:$0xff]  ;;  %v151_v17 = vld [vmem:[#allocation5 + $0x310] sm:$0xff]  ;;  %v638_v18 = vpack.c.bf16 %v160_v11, %v152_v10  ;;  %v166_v20 = vld [vmem:[#allocation5 + $0x388] sm:$0xff] }
  0x4a   :  { %631 = vmatprep.subr.bf16.mxu1 %v630_v57  ;;  %v159_v19 = vld [vmem:[#allocation5 + $0x350] sm:$0xff]  ;;  %v174_v21 = vld [vmem:[#allocation5 + $0x3c8] sm:$0xff]  ;;  %v168_v22 = vld [vmem:[#allocation5 + $0x398] sm:$0xff]  ;;  %v608_v24 = vpack.c.bf16 %v157_v16, %v149_v15 }
  0x4b   :  { %v176_v23 = vld [vmem:[#allocation5 + $0x3d8] sm:$0xff]  ;;  %v640_v25 = vpack.c.bf16 %v159_v19, %v151_v17  ;;  %v610_v26 = vpack.c.bf16 %v174_v21, %v166_v20  ;;  %v165_v27 = vld [vmem:[#allocation5 + $0x380] sm:$0xff]  ;;  %v167_v29 = vld [vmem:[#allocation5 + $0x390] sm:$0xff] }
  0x4c   :  { %601 = vmatpush1.bf16.msra.mxu0 %v600_v63  ;;  %v173_v28 = vld [vmem:[#allocation5 + $0x3c0] sm:$0xff]  ;;  %v642_v30 = vpack.c.bf16 %v176_v23, %v168_v22  ;;  %v175_v31 = vld [vmem:[#allocation5 + $0x3d0] sm:$0xff]  ;;  %v58_v32 = vld [vmem:[#allocation5 + $0x28] sm:$0xff] }
  0x4d   :  { %633 = vmatpush1.bf16.msra.mxu1 %v632_v1  ;;  %603 = vmatprep.subr.bf16.mxu0 %v602_v2  ;;  %v66_v33 = vld [vmem:[#allocation5 + $0x68] sm:$0xff]  ;;  %v60_v34 = vld [vmem:[#allocation5 + $0x38] sm:$0xff]  ;;  %v612_v36 = vpack.c.bf16 %v173_v28, %v165_v27  ;;  %v644_v37 = vpack.c.bf16 %v175_v31, %v167_v29  ;;  %v57_v39 = vld [vmem:[#allocation5 + $0x20] sm:$0xff] }
  0x4e   :  { %635 = vmatprep.subr.bf16.mxu1 %v634_v6  ;;  %v68_v35 = vld [vmem:[#allocation5 + $0x78] sm:$0xff]  ;;  %v646_v38 = vpack.c.bf16 %v66_v33, %v58_v32  ;;  %v65_v40 = vld [vmem:[#allocation5 + $0x60] sm:$0xff]  ;;  %v59_v41 = vld [vmem:[#allocation5 + $0x30] sm:$0xff] }
  0x4f   :  { %v678_v42 = vpack.c.bf16 %v68_v35, %v60_v34  ;;  %v67_v43 = vld [vmem:[#allocation5 + $0x70] sm:$0xff]  ;;  %v74_v44 = vld [vmem:[#allocation5 + $0xa8] sm:$0xff]  ;;  %v76_v46 = vld [vmem:[#allocation5 + $0xb8] sm:$0xff]  ;;  %v648_v49 = vpack.c.bf16 %v65_v40, %v57_v39 }
  0x50   :  { %605 = vmatpush1.bf16.msra.mxu0 %v604_v12  ;;  %v82_v45 = vld [vmem:[#allocation5 + $0xe8] sm:$0xff]  ;;  %v84_v47 = vld [vmem:[#allocation5 + $0xf8] sm:$0xff]  ;;  %v680_v50 = vpack.c.bf16 %v67_v43, %v59_v41  ;;  %v73_v52 = vld [vmem:[#allocation5 + $0xa0] sm:$0xff] }
  0x51   :  { %637 = vmatpush1.bf16.msra.mxu1 %v636_v13  ;;  %607 = vmatprep.subr.bf16.mxu0 %v606_v14  ;;  %v878_v48 = vld [vmem:[#allocation2] sm:$0x1]  ;;  %v650_v51 = vpack.c.bf16 %v82_v45, %v74_v44  ;;  %v81_v53 = vld [vmem:[#allocation5 + $0xe0] sm:$0xff]  ;;  %v75_v54 = vld [vmem:[#allocation5 + $0xb0] sm:$0xff]  ;;  %v682_v55 = vpack.c.bf16 %v84_v47, %v76_v46 }
  0x52   :  { %639 = vmatprep.subr.bf16.mxu1 %v638_v18  ;;  %v83_v56 = vld [vmem:[#allocation5 + $0xf0] sm:$0xff]  ;;  %v90_v57 = vld [vmem:[#allocation5 + $0x128] sm:$0xff]  ;;  %v92_v59 = vld [vmem:[#allocation5 + $0x138] sm:$0xff]  ;;  %v652_v61 = vpack.c.bf16 %v81_v53, %v73_v52 }
  0x53   :  { %v98_v58 = vld [vmem:[#allocation5 + $0x168] sm:$0xff]  ;;  %v100_v60 = vld [vmem:[#allocation5 + $0x178] sm:$0xff]  ;;  %v684_v62 = vpack.c.bf16 %v83_v56, %v75_v54  ;;  %v89_v1 = vld [vmem:[#allocation5 + $0x120] sm:$0xff] }
  0x54   :  { %609 = vmatpush1.bf16.msra.mxu0 %v608_v24  ;;  %v654_v63 = vpack.c.bf16 %v98_v58, %v90_v57  ;;  %v97_v2 = vld [vmem:[#allocation5 + $0x160] sm:$0xff]  ;;  %v91_v3 = vld [vmem:[#allocation5 + $0x130] sm:$0xff]  ;;  %v686_v4 = vpack.c.bf16 %v100_v60, %v92_v59  ;;  %v106_v6 = vld [vmem:[#allocation5 + $0x1a8] sm:$0xff] }
  0x55   :  { %641 = vmatpush1.bf16.msra.mxu1 %v640_v25  ;;  %611 = vmatprep.subr.bf16.mxu0 %v610_v26  ;;  %v99_v5 = vld [vmem:[#allocation5 + $0x170] sm:$0xff]  ;;  %v114_v7 = vld [vmem:[#allocation5 + $0x1e8] sm:$0xff]  ;;  %v108_v8 = vld [vmem:[#allocation5 + $0x1b8] sm:$0xff]  ;;  %v656_v10 = vpack.c.bf16 %v97_v2, %v89_v1 }
  0x56   :  { %643 = vmatprep.subr.bf16.mxu1 %v642_v30  ;;  %v116_v9 = vld [vmem:[#allocation5 + $0x1f8] sm:$0xff]  ;;  %v688_v11 = vpack.c.bf16 %v99_v5, %v91_v3  ;;  %v658_v12 = vpack.c.bf16 %v114_v7, %v106_v6  ;;  %v105_v13 = vld [vmem:[#allocation5 + $0x1a0] sm:$0xff]  ;;  %v107_v15 = vld [vmem:[#allocation5 + $0x1b0] sm:$0xff]  ;;  %v183_v5 = vlaneseq }
  0x57   :  { %v113_v14 = vld [vmem:[#allocation5 + $0x1e0] sm:$0xff]  ;;  %v690_v16 = vpack.c.bf16 %v116_v9, %v108_v8  ;;  %v115_v17 = vld [vmem:[#allocation5 + $0x1f0] sm:$0xff]  ;;  %v122_v18 = vld [vmem:[#allocation5 + $0x228] sm:$0xff] }
  0x58   :  { %613 = vmatpush1.bf16.msra.mxu0 %v612_v36  ;;  %v130_v19 = vld [vmem:[#allocation5 + $0x268] sm:$0xff]  ;;  %v124_v20 = vld [vmem:[#allocation5 + $0x238] sm:$0xff]  ;;  %v660_v22 = vpack.c.bf16 %v113_v14, %v105_v13  ;;  %v121_v24 = vld [vmem:[#allocation5 + $0x220] sm:$0xff]  ;;  %v184_v6 = vshrl.u32 %v183_v5, 7 }
  0x59   :  { %645 = vmatpush1.bf16.msra.mxu1 %v644_v37  ;;  %647 = vmatprep.subr.bf16.mxu0 %v646_v38  ;;  %v132_v21 = vld [vmem:[#allocation5 + $0x278] sm:$0xff]  ;;  %v662_v23 = vpack.c.bf16 %v130_v19, %v122_v18  ;;  %v129_v25 = vld [vmem:[#allocation5 + $0x260] sm:$0xff]  ;;  %v123_v26 = vld [vmem:[#allocation5 + $0x230] sm:$0xff] }
  0x5a   :  { %679 = vmatprep.subr.bf16.mxu1 %v678_v42  ;;  %v694_v27 = vpack.c.bf16 %v132_v21, %v124_v20  ;;  %v131_v28 = vld [vmem:[#allocation5 + $0x270] sm:$0xff]  ;;  %v138_v29 = vld [vmem:[#allocation5 + $0x2a8] sm:$0xff]  ;;  %v140_v31 = vld [vmem:[#allocation5 + $0x2b8] sm:$0xff]  ;;  %v664_v33 = vpack.c.bf16 %v129_v25, %v121_v24  ;;  %v185_v7 = vsub.s32 0, %v184_v6  ;;  %v193_v9 = vsub.s32 2, %v184_v6 }
  0x5b   :  { %288 = vmatmul.mubr.f32.vlgmr.msra.gmra.mrb[0].mxu0 %v878_v48  ;;  %v146_v30 = vld [vmem:[#allocation5 + $0x2e8] sm:$0xff]  ;;  %v148_v32 = vld [vmem:[#allocation5 + $0x2f8] sm:$0xff]  ;;  %v696_v34 = vpack.c.bf16 %v131_v28, %v123_v26  ;;  %v137_v36 = vld [vmem:[#allocation5 + $0x2a0] sm:$0xff]  ;;  %v197_v13 = vsub.s32 3, %v184_v6 }
  0x5c   :  { %359 = vmatmul.mubr.f32.vlgmr.msra.gmra.mrb[0].mxu1 %v878_v48  ;;  %649 = vmatpush1.bf16.msra.mxu0 %v648_v49  ;;  %v666_v35 = vpack.c.bf16 %v146_v30, %v138_v29  ;;  %v145_v37 = vld [vmem:[#allocation5 + $0x2e0] sm:$0xff]  ;;  %v139_v38 = vld [vmem:[#allocation5 + $0x2b0] sm:$0xff]  ;;  %v698_v39 = vpack.c.bf16 %v148_v32, %v140_v31  ;;  %v154_v41 = vld [vmem:[#allocation5 + $0x328] sm:$0xff]  ;;  %v201_v31 = vsub.s32 4, %v184_v6  ;;  %v209_v32 = vsub.s32 6, %v184_v6 }
  0x5d   :  { %681 = vmatpush1.bf16.msra.mxu1 %v680_v50  ;;  %651 = vmatprep.subr.bf16.mxu0 %v650_v51  ;;  %v147_v40 = vld [vmem:[#allocation5 + $0x2f0] sm:$0xff]  ;;  %v162_v42 = vld [vmem:[#allocation5 + $0x368] sm:$0xff]  ;;  %v156_v43 = vld [vmem:[#allocation5 + $0x338] sm:$0xff]  ;;  %v668_v45 = vpack.c.bf16 %v145_v37, %v137_v36 }
  0x5e   :  { %683 = vmatprep.subr.bf16.mxu1 %v682_v55  ;;  %429 = vmatprep.mubr.f32.mxu0 %v817_v0  ;;  %v164_v44 = vld [vmem:[#allocation5 + $0x378] sm:$0xff]  ;;  %v700_v46 = vpack.c.bf16 %v147_v40, %v139_v38  ;;  %v670_v47 = vpack.c.bf16 %v162_v42, %v154_v41  ;;  %v153_v49 = vld [vmem:[#allocation5 + $0x320] sm:$0xff]  ;;  %v155_v51 = vld [vmem:[#allocation5 + $0x330] sm:$0xff] }
  0x5f   :  { %500 = vmatprep.mubr.f32.mxu1 %v817_v0  ;;  %v692_v0 = vpack.c.bf16 %v115_v17, %v107_v15  ;;  %v161_v50 = vld [vmem:[#allocation5 + $0x360] sm:$0xff]  ;;  %v702_v52 = vpack.c.bf16 %v164_v44, %v156_v43  ;;  %v163_v53 = vld [vmem:[#allocation5 + $0x370] sm:$0xff]  ;;  %v170_v54 = vld [vmem:[#allocation5 + $0x3a8] sm:$0xff] }
  0x60   :  { %653 = vmatpush1.bf16.msra.mxu0 %v652_v61  ;;  %v178_v55 = vld [vmem:[#allocation5 + $0x3e8] sm:$0xff]  ;;  %v172_v56 = vld [vmem:[#allocation5 + $0x3b8] sm:$0xff]  ;;  %v672_v58 = vpack.c.bf16 %v161_v50, %v153_v49  ;;  %v704_v59 = vpack.c.bf16 %v163_v53, %v155_v51  ;;  %v169_v61 = vld [vmem:[#allocation5 + $0x3a0] sm:$0xff] }
  0x61   :  { %685 = vmatpush1.bf16.msra.mxu1 %v684_v62  ;;  %655 = vmatprep.subr.bf16.mxu0 %v654_v63  ;;  %v180_v57 = vld [vmem:[#allocation5 + $0x3f8] sm:$0xff]  ;;  %v674_v60 = vpack.c.bf16 %v178_v55, %v170_v54  ;;  %v177_v62 = vld [vmem:[#allocation5 + $0x3e0] sm:$0xff]  ;;  %v171_v1 = vld [vmem:[#allocation5 + $0x3b0] sm:$0xff] }
  0x62   :  { %687 = vmatprep.subr.bf16.mxu1 %v686_v4  ;;  %v706_v63 = vpack.c.bf16 %v180_v57, %v172_v56  ;;  %v179_v2 = vld [vmem:[#allocation5 + $0x3f0] sm:$0xff]  ;;  %v676_v3 = vpack.c.bf16 %v177_v62, %v169_v61  ;;  %v181_v8 = vld [vmem:[#allocation7] sm:$0xff] }
  0x63   :  { %v708_v4 = vpack.c.bf16 %v179_v2, %v171_v1  ;;  %v186_v14 = vrot.slane %v181_v8, %v185_v7  ;;  %v194_v15 = vrot.slane %v181_v8, %v193_v9  ;;  %v198_v18 = vrot.slane %v181_v8, %v197_v13 }
  0x64   :  { %657 = vmatpush1.bf16.msra.mxu0 %v656_v10  ;;  %v189_v10 = vsub.s32 1, %v184_v6  ;;  %v210_v36 = vrot.slane %v181_v8, %v209_v32 }
  0x65   :  { %689 = vmatpush1.bf16.msra.mxu1 %v688_v11  ;;  %659 = vmatprep.subr.bf16.mxu0 %v658_v12  ;;  %v818_v11 = vmov 1966171168  }
  0x66   :  { %691 = vmatprep.subr.bf16.mxu1 %v690_v16  ;;  %v520_v12 = vunpack.c.l.s4 %v818_v11  ;;  %v190_v16 = vrot.slane %v181_v8, %v189_v10 }
  0x68   :  { %661 = vmatpush1.bf16.msra.mxu0 %v660_v22  ;;  %v521_v17 = vunpack.c.0.s8 %v520_v12 }
  0x69   :  { %693 = vmatpush1.bf16.msra.mxu1 %v692_v0  ;;  %663 = vmatprep.subr.bf16.mxu0 %v662_v23 }
  0x6a   :  { %695 = vmatprep.subr.bf16.mxu1 %v694_v27  ;;  %v524_v23 = vsub.s32 %v521_v17, %v184_v6 }
  0x6c   :  { %665 = vmatpush1.bf16.msra.mxu0 %v664_v33  ;;  %v205_v33 = vsub.s32 5, %v184_v6 }
  0x6d   :  { %697 = vmatpush1.bf16.msra.mxu1 %v696_v34  ;;  %667 = vmatprep.subr.bf16.mxu0 %v666_v35  ;;  %v213_v34 = vsub.s32 7, %v184_v6  ;;  %v202_v35 = vrot.slane %v181_v8, %v201_v31 }
  0x6e   :  { %699 = vmatprep.subr.bf16.mxu1 %v698_v39  ;;  %v206_v37 = vrot.slane %v181_v8, %v205_v33 }
  0x6f   :  { %v214_v38 = vrot.slane %v181_v8, %v213_v34 }
  0x70   :  { %669 = vmatpush1.bf16.msra.mxu0 %v668_v45 }
  0x71   :  { %701 = vmatpush1.bf16.msra.mxu1 %v700_v46  ;;  %671 = vmatprep.subr.bf16.mxu0 %v670_v47 }
  0x72   :  { %703 = vmatprep.subr.bf16.mxu1 %v702_v52 }
  0x74   :  { %673 = vmatpush1.bf16.msra.mxu0 %v672_v58 }
  0x75   :  { %705 = vmatpush1.bf16.msra.mxu1 %v704_v59  ;;  %675 = vmatprep.subr.bf16.mxu0 %v674_v60 }
  0x76   :  { %707 = vmatprep.subr.bf16.mxu1 %v706_v63 }
  0x78   :  { %677 = vmatpush1.bf16.msra.mxu0 %v676_v3 }
  0x79   :  { %709 = vmatpush1.bf16.msra.mxu1 %v708_v4 }
  0x7b   :  { %430 = vmatmul.mubr.f32.vlgmr.msra.gmra.mrb[2].mxu0 %v878_v48 }
  0x7c   :  { %501 = vmatmul.mubr.f32.vlgmr.msra.gmra.mrb[2].mxu1 %v878_v48 }
 0x12e   :  { %v289_v19 = vpop.f32.mrb[0].mxu0 }
 0x12f   :  { %v290_v20 = vadd.f32 %v289_v19, %v186_v14  ;;  %v360_v21 = vpop.f32.mrb[0].mxu1  ;;  %v291_v22 = vpop.f32.mrb[1].mxu0 }
 0x130   :  { %v361_v0 = vadd.f32 %v360_v21, %v194_v15  ;;  %v292_v48 = vadd.f32 %v291_v22, %v190_v16  ;;  %v362_v24 = vpop.f32.mrb[1].mxu1 }
 0x131   :  { %v363_v25 = vadd.f32 %v362_v24, %v198_v18 }
 0x132   :  { %v515_v26 = vcombine.low %v290_v20, %v292_v48 }
 0x133   :  { %v516_v27 = vcombine.low %v361_v0, %v363_v25 }
 0x134   :  { %v525_v28 = vrot.slane %v515_v26, %v524_v23 }
 0x135   :  { %v532_v29 = vrot.slane %v516_v27, %v524_v23 }
 0x137   :  { %v547_v30 = vcombine.low %v525_v28, %v532_v29 }
 0x139   :  { %v555_v53 = vrot.slane %v547_v30, %v524_v23 }
 0x14e   :  { %v431_v39 = vpop.f32.mrb[2].mxu0 }
 0x14f   :  { %v432_v40 = vadd.f32 %v431_v39, %v202_v35  ;;  %v502_v41 = vpop.f32.mrb[2].mxu1  ;;  %v433_v42 = vpop.f32.mrb[3].mxu0 }
 0x150   :  { %v503_v43 = vadd.f32 %v502_v41, %v210_v36  ;;  %v434_v44 = vadd.f32 %v433_v42, %v206_v37  ;;  %v504_v45 = vpop.f32.mrb[3].mxu1 }
 0x151   :  { %v505_v46 = vadd.f32 %v504_v45, %v214_v38 }
 0x152   :  { %v517_v47 = vcombine.low %v432_v40, %v434_v44 }
 0x153   :  { %v518_v49 = vcombine.low %v503_v43, %v505_v46 }
 0x154   :  { %v539_v50 = vrot.slane %v517_v47, %v524_v23 }
 0x155   :  { %v546_v51 = vrot.slane %v518_v49, %v524_v23 }
 0x157   :  { %v548_v52 = vcombine.low %v539_v50, %v546_v51 }
 0x159   :  { %v562_v54 = vrot.slane %v548_v52, %v524_v23 }
 0x15b   :  { %v563_v55 = vcombine.low %v555_v53, %v562_v54 }
 0x15d   :  { %565 = vst [vmem:[#allocation8] sm:$0xff] %v563_v55 }
 0x15e   :  { %795 = shalt.err (!%p792_p0)
}
 0x15f   :  { %s796_s26 = scalar_lea.hbm %s901_s3, 128 }
 0x160   :  { %p797_p1 = scmp.ne.s32.totalorder %s901_s3, %s796_s26  ;;  %p800_p2 = scmp.lt.u32.totalorder %s796_s26, %s901_s3 }
 0x162   :  { %p802_p3 = pnand %p800_p2, %p797_p1 }
 0x164   :  { %805 = shalt.err (!%p802_p3)
}
 0x165   :  { %575 = dma.vmem_to_hbm [thread:$0]  %s573_s22, 128, %s901_s3, [#allocation4]  }
 0x166   :  { %810 = dma.done.wait [#allocation4], 128  }
 0x167   :  { %811 = vsyncadd [#allocation4], 4294967168 }
 0x168   :  { %579 = vsyncpa [#allocation3], 1 }
 0x169   :  { %580 = vsyncpa [#allocation6], 1 }
 0x16a   :  { %581 = vsyncpa [#allocation4], 1 }

</bundles_post_ra>
